<compile_context>
chip_gen: v7x
topology: tpu7x:2x2x1
jax: 0.10.0
libtpu: 0.0.40
codegen_flags: <defaults>
</compile_context>

<pallas_src>
import functools

import jax
import jax.numpy as jnp
from jax.experimental import pallas as pl
from jax.experimental.pallas import tpu as pltpu

_LANE = 128


def _dorefa_a_kernel(x_ref, o_ref, *, scale, do_quant):
    # Upcast to f32: clamp/round at full precision regardless of storage dtype,
    # so bf16 inputs quantize to the same levels as the f32 PyTorch reference.
    x = x_ref[...].astype(jnp.float32)
    y = jnp.clip(x, 0.0, 1.0)
    if do_quant:
        y = jnp.round(scale * y) * (1.0 / scale)
    o_ref[...] = y.astype(o_ref.dtype)


def _dorefa_scale(nbit_a, alpha):
    # NOTE: alpha must be a static Python/NumPy scalar (as in the PyTorch module,
    # where DoReFaA passes a plain float); a traced alpha is not supported here.
    levels = float(2 ** nbit_a - 1)
    return levels if alpha is None else levels / float(alpha)


def _dorefa_plain(x, nbit_a, alpha):
    """Plain-jnp fallback for the tiny (<128 element) tail / sub-vreg tensors."""
    y = jnp.clip(x.astype(jnp.float32), 0.0, 1.0)
    if nbit_a != 32:
        scale = _dorefa_scale(nbit_a, alpha)
        y = jnp.round(scale * y) * (1.0 / scale)
    return y.astype(x.dtype)


def _vmem_limit_bytes(default=48 << 20):
    """Scoped-VMEM budget: generation aware when queryable, safe constant otherwise."""
    try:
        cap = int(getattr(pltpu.get_tpu_info(), "vmem_capacity_bytes", 0))
    except Exception:
        cap = 0
    if cap > 0:
        # Keep well inside physical VMEM (v7x: 64 MiB; v5e/v6e: 128 MiB).
        return min(default, (cap * 3) // 4)
    return default


def dorefa_a(x, nbit_a, alpha=None, *,
             target_block_bytes=8 << 20, min_block_bytes=1 << 20):
    """DoReFaA forward. x: float array (any shape, e.g. NCHW). nbit_a: python int."""
    orig_shape = x.shape
    orig_dtype = x.dtype
    total = x.size

    do_quant = (nbit_a != 32)
    scale = _dorefa_scale(nbit_a, alpha) if do_quant else 1.0

    x_flat = jnp.reshape(x, (-1,))              # row-major reshape: free
    bulk = (total // _LANE) * _LANE             # 128-aligned bulk -> kernel
    tail = total - bulk                         # <128-element tail -> plain jnp

    if bulk == 0:
        return jnp.reshape(_dorefa_plain(x_flat, nbit_a, alpha), orig_shape)

    rows = bulk // _LANE
    # When total is 128-aligned (the common case for activation tensors) this
    # path is copy-free: no slice, no pad, no concatenate.
    x_bulk = x_flat if tail == 0 else x_flat[:bulk]
    x2d = jnp.reshape(x_bulk, (rows, _LANE))

    itemsize = jnp.dtype(orig_dtype).itemsize
    row_bytes = _LANE * itemsize
    # Sublane packing is dtype dependent: 8 rows/vreg (4B), 16 (2B), 32 (1B).
    sublane = max(8, 32 // max(itemsize, 1))

    vmem_limit = _vmem_limit_bytes()
    # 2 in + 2 out double buffers per block, plus headroom -> block <= limit/6.
    block_bytes = max(row_bytes * sublane, min(target_block_bytes, vmem_limit // 6))
    floor_bytes = min(block_bytes, max(row_bytes * sublane, min_block_bytes))

    if rows <= sublane:
        # Block equals the full array dims (allowed even when rows % 8 != 0).
        tile_rows = rows
    else:
        cap_rows = max(sublane, (block_bytes // row_bytes) // sublane * sublane)
        floor_rows = max(sublane, (floor_bytes // row_bytes) // sublane * sublane)
        # Aim for >= 8 grid steps (per-core double buffering under megacore),
        # but never shrink blocks below the ~1 MiB streaming plateau and never
        # grow past the VMEM-derived cap.
        eight_way_rows = pl.cdiv(pl.cdiv(rows, 8), sublane) * sublane
        tile_rows = min(cap_rows, max(floor_rows, eight_way_rows))
        if tile_rows >= rows:
            tile_rows = rows            # small tensor: one full-extent block

    grid = (pl.cdiv(rows, tile_rows),)          # partial last block is masked

    kernel = functools.partial(_dorefa_a_kernel, scale=scale, do_quant=do_quant)

    cost = pl.CostEstimate(
        flops=(5 if do_quant else 2) * bulk,
        transcendentals=0,
        bytes_accessed=2 * bulk * itemsize,
    )

    out2d = pl.pallas_call(
        kernel,
        out_shape=jax.ShapeDtypeStruct((rows, _LANE), orig_dtype),
        grid_spec=pltpu.PrefetchScalarGridSpec(
            num_scalar_prefetch=0,
            grid=grid,
            in_specs=[pl.BlockSpec((tile_rows, _LANE), lambda i: (i, 0))],
            out_specs=pl.BlockSpec((tile_rows, _LANE), lambda i: (i, 0)),
        ),
        compiler_params=pltpu.CompilerParams(
            dimension_semantics=("parallel",),
            vmem_limit_bytes=vmem_limit,
        ),
        cost_estimate=cost,
    )(x2d)

    if tail == 0:
        return jnp.reshape(out2d, orig_shape)

    out_flat = jnp.reshape(out2d, (-1,))
    tail_out = _dorefa_plain(x_flat[bulk:], nbit_a, alpha)   # <128 elements
    out_flat = jnp.concatenate([out_flat, tail_out])
    return jnp.reshape(out_flat, orig_shape)


def _dorefa_a_ref(x, nbit_a, alpha=None):
    """Pure-jnp reference, faithful to the PyTorch forward."""
    y = jnp.clip(x, 0.0, 1.0)
    if nbit_a == 32:
        return y
    scale = (2 ** nbit_a - 1) if alpha is None else (2 ** nbit_a - 1) / alpha
    return jnp.round(scale * y) / scale


if __name__ == "__main__":
    key = jax.random.PRNGKey(0)
    k1, k2, k3 = jax.random.split(key, 3)

    # Small NCHW input, values spanning below 0 and above 1 to exercise the clamp.
    x = jax.random.normal(k1, (2, 4, 16, 16), dtype=jnp.float32) * 1.5 + 0.25

    # 4-bit quantization (no alpha).
    out = jax.block_until_ready(dorefa_a(x, 4))
    ref = _dorefa_a_ref(x, 4)
    assert out.shape == x.shape and out.dtype == x.dtype
    assert jnp.allclose(out, ref, atol=1e-6), "mismatch vs reference (nbit=4)"

    # nbit == 32 passthrough (still clamped).
    out32 = jax.block_until_ready(dorefa_a(x, 32))
    assert jnp.allclose(out32, _dorefa_a_ref(x, 32), atol=1e-6), "mismatch (nbit=32)"

    # Awkward (non-128-multiple) size + alpha: exercises kernel-bulk + jnp-tail path.
    x_odd = jax.random.normal(k2, (3, 5, 7, 9), dtype=jnp.float32) * 1.2
    out_odd = jax.block_until_ready(dorefa_a(x_odd, 3, alpha=0.8))
    assert jnp.allclose(out_odd, _dorefa_a_ref(x_odd, 3, alpha=0.8), atol=1e-6), \
        "mismatch vs reference (odd shape, alpha)"

    # Multi-step grid with a masked partial last block (small block overrides so a
    # tiny tensor still exercises the tiled path: rows=33, tile_rows=8, grid=5).
    x_tile = jax.random.normal(k3, (2, 4, 33, 16), dtype=jnp.float32) * 1.3 + 0.1
    out_tile = jax.block_until_ready(
        dorefa_a(x_tile, 2, alpha=0.5, target_block_bytes=8 * 1024, min_block_bytes=1))
    assert jnp.allclose(out_tile, _dorefa_a_ref(x_tile, 2, alpha=0.5), atol=1e-6), \
        "mismatch vs reference (tiled / partial block)"

    # bf16 input: kernel computes in f32, stores bf16.
    x_bf = x.astype(jnp.bfloat16)
    out_bf = jax.block_until_ready(dorefa_a(x_bf, 4))
    ref_bf = _dorefa_a_ref(x_bf.astype(jnp.float32), 4).astype(jnp.bfloat16)
    assert out_bf.dtype == jnp.bfloat16
    assert jnp.allclose(out_bf.astype(jnp.float32), ref_bf.astype(jnp.float32),
                        atol=8e-3), "mismatch vs reference (bf16)"

    print("KERNEL_OK")
</pallas_src>

<mosaic_0001>
module attributes {stable_mosaic.version = 11 : i64} {
  func.func @_dorefa_a_kernel(%arg0: i32, %arg1: memref<16x128xf32, #tpu.memory_space<vmem>>, %arg2: memref<16x128xf32, #tpu.memory_space<vmem>>) attributes {dimension_semantics = [#tpu.dimension_semantics<parallel>], iteration_bounds = array<i64: 1>, scalar_prefetch = 0 : i64, scratch_operands = 0 : i64, tpu.core_type = #tpu.core_type<tc>, window_params = [{transform_indices = @transform_0, window_bounds = array<i64: 16, 128>}, {transform_indices = @transform_1, window_bounds = array<i64: 16, 128>}]} {
    %c0 = arith.constant 0 : index
    %c0_0 = arith.constant 0 : index
    %0 = vector.load %arg1[%c0, %c0_0] : memref<16x128xf32, #tpu.memory_space<vmem>>, vector<16x128xf32>
    %cst = arith.constant 0.000000e+00 : f32
    %cst_1 = arith.constant 1.000000e+00 : f32
    %1 = vector.broadcast %cst : f32 to vector<16x128xf32>
    %2 = arith.maximumf %1, %0 : vector<16x128xf32>
    %3 = vector.broadcast %cst_1 : f32 to vector<16x128xf32>
    %4 = arith.minimumf %3, %2 : vector<16x128xf32>
    %cst_2 = arith.constant 1.500000e+01 : f32
    %5 = vector.broadcast %cst_2 : f32 to vector<16x128xf32>
    %6 = arith.mulf %5, %4 : vector<16x128xf32>
    %7 = math.roundeven %6 : vector<16x128xf32>
    %cst_3 = arith.constant 0.0666666701 : f32
    %8 = vector.broadcast %cst_3 : f32 to vector<16x128xf32>
    %9 = arith.mulf %7, %8 : vector<16x128xf32>
    %c0_4 = arith.constant 0 : index
    %c0_5 = arith.constant 0 : index
    %10 = vector.load %arg2[%c0_4, %c0_5] : memref<16x128xf32, #tpu.memory_space<vmem>>, vector<16x128xf32>
    tpu.vector_store %arg2[%c0_4, %c0_5], %9 {strides = array<i32>} : memref<16x128xf32, #tpu.memory_space<vmem>>, vector<16x128xf32>,
    return
  }
  func.func @transform_0(%arg0: i32) -> (i32, i32) {
    %c0_i32 = arith.constant 0 : i32
    %c0_i32_0 = arith.constant 0 : i32
    return %arg0, %c0_i32 : i32, i32
  }
  func.func @transform_1(%arg0: i32) -> (i32, i32) {
    %c0_i32 = arith.constant 0 : i32
    %c0_i32_0 = arith.constant 0 : i32
    return %arg0, %c0_i32 : i32, i32
  }
}

</mosaic_0001>

<bundles_post_ra>
// kernel: tpu_custom_call.1
= control target key start
LH: loop header
LB: loop body
LE: loop exit
PB: predicated region body
PF: predicated region fallthrough
CT: control target
= control target key end

     0   :  { %6 = vsyncpa [#allocation3], 0  ;;  %s152_s0 = inlined_call_operand.hbm [shape: f32[16,128], index: 0, kind: input, shape index: {}]   ;;  %s153_s1 = inlined_call_operand.hbm [shape: f32[16,128], index: 1, kind: output, shape index: {}]  }
   0x1   :  { %7 = vsyncpa [#allocation4], 0  ;;  %s108_s6 = smov [#allocation2]   ;;  %s60_s10 = scalar_lea.hbm %s152_s0, 256 }
   0x2   :  { %s13_s7 = sshll.u32 %s108_s6, 4  ;;  %p61_p0 = scmp.ne.s32.totalorder %s152_s0, %s60_s10  ;;  %s14_s7 = int_to_ptr.vmem [resolvable:$true] %s13_s7 }
   0x3   :  { %p64_p1 = scmp.lt.u32.totalorder %s60_s10, %s152_s0 }
   0x5   :  { %p66_p2 = pnand %p64_p1, %p61_p0 }
   0x7   :  { %69 = shalt.err (!%p66_p2)
}
   0x8   :  { %s70_s15 = scalar_lea.vmem %s14_s7, 256  ;;  %p75_p4 = scmp.lt.s32.totalorder %s14_s7, %s14_s7 }
   0x9   :  { %p71_p3 = scmp.ne.s32.totalorder %s14_s7, %s70_s15  ;;  %p76_p5 = scmp.lt.s32.totalorder %s70_s15, %s70_s15 }
   0xb   :  { %p77_p6 = por %p76_p5, %p75_p4 }
   0xd   :  { %p78_p7 = pnand %p77_p6, %p71_p3 }
   0xf   :  { %81 = shalt.err (!%p78_p7)
}
  0x10   :  { %s109_s16 = smov 128   ;;  %s110_s17 = smov 8  }
  0x11   :  { %19 = dma.hbm_to_vmem [thread:$0]  %s152_s0, 256, %s14_s7, [#allocation3], %s109_s16, %s109_s16, %s110_s17  }
  0x12   :  { %104 = dma.done.wait [#allocation3], 256  }
  0x13   :  { %105 = vsyncadd [#allocation3], 4294967040  ;;  %v23_v0 = vld [vmem:[#allocation2] sm:$0xff]  ;;  %v24_v1 = vld [vmem:[#allocation2 + $0x8] sm:$0xff]  ;;  %s111_s20 = smov [#allocation5]  }
  0x14   :  { %v25_v2 = vmax.f32 %v23_v0, 0.0  ;;  %v26_v3 = vmax.f32 %v24_v1, 0.0  ;;  %s42_s21 = sshll.u32 %s111_s20, 4  ;;  %s43_s21 = int_to_ptr.vmem [resolvable:$true] %s42_s21 }
  0x15   :  { %s82_s0 = scalar_lea.vmem %s43_s21, 256  ;;  %p87_p9 = scmp.lt.s32.totalorder %s43_s21, %s43_s21 }
  0x16   :  { %v27_v4 = vmin.f32 %v25_v2, 1.0  ;;  %v28_v5 = vmin.f32 %v26_v3, 1.0  ;;  %p83_p8 = scmp.ne.s32.totalorder %s43_s21, %s82_s0  ;;  %p88_p10 = scmp.lt.s32.totalorder %s82_s0, %s82_s0 }
  0x18   :  { %v29_v6 = vmul.f32 15.0, %v27_v4  ;;  %v30_v7 = vmul.f32 15.0, %v28_v5  ;;  %p89_p11 = por %p88_p10, %p87_p9 }
  0x1a   :  { %v54_v8 = vround.rtne.f32 %v29_v6  ;;  %v55_v9 = vround.rtne.f32 %v30_v7  ;;  %p90_p12 = pnand %p89_p11, %p83_p8 }
  0x1c   :  { %v33_v10 = vmul.f32 0.06666667, %v54_v8  ;;  %v34_v11 = vmul.f32 0.06666667, %v55_v9 }
  0x1e   :  { %35 = vst [vmem:[#allocation5] sm:$0xff] %v33_v10  ;;  %36 = vst [vmem:[#allocation5 + $0x8] sm:$0xff] %v34_v11 }
  0x1f   :  { %93 = shalt.err (!%p90_p12)
}
  0x20   :  { %s94_s24 = scalar_lea.hbm %s153_s1, 256 }
  0x21   :  { %p95_p13 = scmp.ne.s32.totalorder %s153_s1, %s94_s24  ;;  %p98_p0 = scmp.lt.u32.totalorder %s94_s24, %s153_s1 }
  0x23   :  { %p100_p1 = pnand %p98_p0, %p95_p13 }
  0x25   :  { %103 = shalt.err (!%p100_p1)
}
  0x26   :  { %48 = dma.vmem_to_hbm [thread:$0]  %s43_s21, 256, %s153_s1, [#allocation4], %s109_s16, %s109_s16, %s110_s17  }
  0x27   :  { %106 = dma.done.wait [#allocation4], 256  }
  0x28   :  { %107 = vsyncadd [#allocation4], 4294967040 }
  0x29   :  { %52 = vsyncpa [#allocation3], 1 }
  0x2a   :  { %53 = vsyncpa [#allocation4], 1 }

</bundles_post_ra>
